<compile_context>
chip_gen: v7x
topology: tpu7x:2x2x1
jax: 0.10.0
libtpu: 0.0.40
codegen_flags: <defaults>
</compile_context>

<pallas_src>
import functools

import jax
import jax.numpy as jnp
from jax.experimental import pallas as pl
from jax.experimental.pallas import tpu as pltpu


def _round_up(x, m):
    return ((x + m - 1) // m) * m


def _linear_bias_relu(x_ref, w_ref, b_ref):
    # x_ref: [tb, K] (f32 or bf16), w_ref: [K, tn] bf16 (pre-transposed at init),
    # b_ref: [1, tn] f32.
    x = x_ref[...]
    if x.dtype != jnp.bfloat16:
        x = x.astype(jnp.bfloat16)                  # cheap VPU cast; MXU-native width
    acc = jax.lax.dot_general(                      # NN matmul: x[tb,K] @ w[K,tn]
        x, w_ref[...],
        dimension_numbers=(((1,), (0,)), ((), ())),
        preferred_element_type=jnp.float32)         # f32 accumulate on the MXU
    return jnp.maximum(acc + b_ref[...], 0.0)       # bias broadcast + ReLU (f32)


def linear_relu_kernel(x_ref, w_ref, b_ref, o_ref):
    o_ref[...] = _linear_bias_relu(x_ref, w_ref, b_ref).astype(o_ref.dtype)


def linear_relu_dropout_kernel(x_ref, w_ref, b_ref, m_ref, o_ref, *, inv_keep_prob):
    out = _linear_bias_relu(x_ref, w_ref, b_ref)
    # Inverted dropout: mask holds {0, 1} in bf16; scale folded in as an f32 constant.
    out = out * (m_ref[...].astype(jnp.float32) * inv_keep_prob)
    o_ref[...] = out.astype(o_ref.dtype)


def skipthoughts_embedding_forward(x_t_vec, weight_kn, bias, out_dropout=-1,
                                   dropout_seed=0, out_dtype=jnp.float32):
    """Forward pass of Skipthoughts_Embedding_Module (post-seq2vec).

    x_t_vec   : [B, 2400] float32 or bfloat16 (seq2vec sentence vectors)
    weight_kn : [2400, embed_dim]  pre-transposed nn.Linear weight, bf16 preferred
                (the transpose + bf16 cast happen ONCE at model init)
    bias      : [embed_dim] float32
    NOTE: bf16 matmul inputs are an intentional precision change vs the f32 PyTorch
    Linear; accumulation and the epilogue remain f32.
    Callers must vary dropout_seed per training step.
    """
    B, K = x_t_vec.shape
    K2, N = weight_kn.shape
    assert K == K2 == 2400

    w = weight_kn if weight_kn.dtype == jnp.bfloat16 else weight_kn.astype(jnp.bfloat16)
    b2 = bias.reshape(1, N).astype(jnp.float32)

    # Pad batch to a multiple of the batch tile (>= 8 sublanes, <= 512 rows).
    tb = min(512, _round_up(max(B, 1), 8))
    B_pad = _round_up(B, tb)
    x_p = x_t_vec if B_pad == B else jnp.pad(x_t_vec, ((0, B_pad - B), (0, 0)))

    # Split N into two lane-dense output tiles when possible so v7x's second
    # TensorCore gets work even at small batch; both tiles stay >= 128 lanes.
    n_tiles = 2 if (N % 256 == 0) else 1
    tn = N // n_tiles
    grid = (B_pad // tb, n_tiles)

    x_spec = pl.BlockSpec((tb, K), lambda i, j: (i, 0))
    w_spec = pl.BlockSpec((K, tn), lambda i, j: (0, j))   # VMEM-resident across batch tiles
    b_spec = pl.BlockSpec((1, tn), lambda i, j: (0, j))
    o_spec = pl.BlockSpec((tb, tn), lambda i, j: (i, j))
    m_spec = pl.BlockSpec((tb, tn), lambda i, j: (i, j))

    out_dtype = jnp.dtype(out_dtype)

    # Dropout configuration (F.dropout semantics: training=True).
    use_mask = False
    inv_keep_prob = 1.0
    if out_dropout >= 0:
        keep_prob = 1.0 - float(out_dropout)
        if keep_prob <= 0.0:
            return jnp.zeros((B, N), out_dtype)
        if keep_prob < 1.0:                         # keep_prob == 1 -> exact identity
            use_mask = True
            inv_keep_prob = 1.0 / keep_prob
            keep = jax.random.bernoulli(jax.random.PRNGKey(dropout_seed),
                                        p=keep_prob, shape=(B_pad, N))
            mask = keep.astype(jnp.bfloat16)

    # Explicit VMEM budget only when the (larger) tiles actually need it.
    vmem_need = (2 * tb * K * x_p.dtype.itemsize            # x, double-buffered
                 + 2 * K * tn * 2                            # bf16 weight
                 + 2 * tn * 4                                # bias
                 + 2 * tb * tn * out_dtype.itemsize)         # output
    if use_mask:
        vmem_need += 2 * tb * tn * 2
    cp_kwargs = {"dimension_semantics": ("parallel", "parallel")}
    if vmem_need > 12 * 1024 * 1024:
        cp_kwargs["vmem_limit_bytes"] = int(vmem_need + 4 * 1024 * 1024)
    compiler_params = pltpu.CompilerParams(**cp_kwargs)

    bytes_accessed = (x_p.size * x_p.dtype.itemsize + w.size * 2 + b2.size * 4
                      + B_pad * N * out_dtype.itemsize
                      + (B_pad * N * 2 if use_mask else 0))
    cost = pl.CostEstimate(flops=2 * B_pad * K * N, transcendentals=0,
                           bytes_accessed=bytes_accessed)

    if use_mask:
        kernel = functools.partial(linear_relu_dropout_kernel,
                                   inv_keep_prob=inv_keep_prob)
        out = pl.pallas_call(
            kernel,
            out_shape=jax.ShapeDtypeStruct((B_pad, N), out_dtype),
            grid=grid,
            in_specs=[x_spec, w_spec, b_spec, m_spec],
            out_specs=o_spec,
            compiler_params=compiler_params,
            cost_estimate=cost,
        )(x_p, w, b2, mask)
    else:
        out = pl.pallas_call(
            linear_relu_kernel,
            out_shape=jax.ShapeDtypeStruct((B_pad, N), out_dtype),
            grid=grid,
            in_specs=[x_spec, w_spec, b_spec],
            out_specs=o_spec,
            compiler_params=compiler_params,
            cost_estimate=cost,
        )(x_p, w, b2)

    return out[:B] if B_pad != B else out


if __name__ == "__main__":
    key = jax.random.PRNGKey(0)
    k_x, k_w, k_b = jax.random.split(key, 3)

    B = 2            # batch of sentences
    K = 2400         # skipthoughts sentence-vector width (fixed by module)
    EMBED_DIM = 128  # opt['embed']['embed_dim']

    # Deterministic "seq2vec output" stand-in.
    x_t_vec = jax.random.normal(k_x, (B, K), dtype=jnp.float32)

    # nn.Linear default init: U(-1/sqrt(in), 1/sqrt(in)).  One-time "model init"
    # layout change: transpose to [K, N] and cast to bf16 (what the kernel consumes).
    bound = 1.0 / (K ** 0.5)
    weight_nk_f32 = jax.random.uniform(k_w, (EMBED_DIM, K), jnp.float32, -bound, bound)
    weight_kn = weight_nk_f32.T.astype(jnp.bfloat16)          # init-time, not per-call
    bias = jax.random.uniform(k_b, (EMBED_DIM,), jnp.float32, -bound, bound)

    # Default path: no dropout (out_dropout = -1), matching the PyTorch default.
    out = skipthoughts_embedding_forward(x_t_vec, weight_kn, bias, out_dropout=-1)
    out = jax.block_until_ready(out)

    # Pure-JAX reference with the same bf16 rounding of inputs, f32 math.
    x_bf = x_t_vec.astype(jnp.bfloat16).astype(jnp.float32)
    w_bf = weight_kn.astype(jnp.float32)
    ref = jnp.maximum(x_bf @ w_bf + bias, 0.0)
    assert out.shape == (B, EMBED_DIM)
    assert jnp.allclose(out, ref, atol=1e-3, rtol=1e-3)

    # Smoke-test the fused dropout path (out_dropout >= 0 branch of the module).
    out_do = skipthoughts_embedding_forward(x_t_vec, weight_kn, bias,
                                            out_dropout=0.5, dropout_seed=123)
    out_do = jax.block_until_ready(out_do)
    assert out_do.shape == (B, EMBED_DIM)
    assert bool(jnp.all(jnp.isfinite(out_do)))
    # Kept entries equal the no-dropout output scaled by 1/keep_prob; dropped are 0.
    kept = out_do != 0
    assert bool(jnp.all(jnp.abs(jnp.where(kept, out_do - 2.0 * out, 0.0)) < 1e-2))

    # out_dropout = 0 must be an exact identity (keep_prob == 1 path).
    out_id = skipthoughts_embedding_forward(x_t_vec, weight_kn, bias, out_dropout=0)
    out_id = jax.block_until_ready(out_id)
    assert jnp.allclose(out_id, out)

    print("KERNEL_OK")
</pallas_src>

<mosaic_0001>
module attributes {stable_mosaic.version = 11 : i64} {
  func.func @linear_relu_kernel(%arg0: i32, %arg1: i32, %arg2: memref<8x2400xf32, #tpu.memory_space<vmem>>, %arg3: memref<2400x128xbf16, #tpu.memory_space<vmem>>, %arg4: memref<1x128xf32, #tpu.memory_space<vmem>>, %arg5: memref<8x128xf32, #tpu.memory_space<vmem>>) attributes {dimension_semantics = [#tpu.dimension_semantics<parallel>, #tpu.dimension_semantics<parallel>], iteration_bounds = array<i64: 1, 1>, scalar_prefetch = 0 : i64, scratch_operands = 0 : i64, tpu.core_type = #tpu.core_type<tc>, window_params = [{transform_indices = @transform_0, window_bounds = array<i64: 8, 2400>}, {transform_indices = @transform_1, window_bounds = array<i64: 2400, 128>}, {transform_indices = @transform_2, window_bounds = array<i64: 1, 128>}, {transform_indices = @transform_3, window_bounds = array<i64: 8, 128>}]} {
    %c0 = arith.constant 0 : index
    %c0_0 = arith.constant 0 : index
    %0 = vector.load %arg2[%c0, %c0_0] : memref<8x2400xf32, #tpu.memory_space<vmem>>, vector<8x2400xf32>
    %1 = arith.truncf %0 : vector<8x2400xf32> to vector<8x2400xbf16>
    %c0_1 = arith.constant 0 : index
    %c0_2 = arith.constant 0 : index
    %2 = vector.load %arg3[%c0_1, %c0_2] : memref<2400x128xbf16, #tpu.memory_space<vmem>>, vector<2400x128xbf16>
    %cst = arith.constant dense<0.000000e+00> : vector<8x128xf32>
    %3 = tpu.matmul %1, %2, %cst {dimension_numbers = #tpu.dot_dimension_numbers<[1], [0], [0], [1], [0, 0, 1, 1], [], []>} : vector<8x2400xbf16>, vector<2400x128xbf16>, vector<8x128xf32> -> vector<8x128xf32>
    %c0_3 = arith.constant 0 : index
    %c0_4 = arith.constant 0 : index
    %4 = vector.load %arg4[%c0_3, %c0_4] : memref<1x128xf32, #tpu.memory_space<vmem>>, vector<1x128xf32>
    %5 = vector.broadcast %4 : vector<1x128xf32> to vector<8x128xf32>
    %6 = arith.addf %3, %5 : vector<8x128xf32>
    %cst_5 = arith.constant 0.000000e+00 : f32
    %7 = vector.broadcast %cst_5 : f32 to vector<8x128xf32>
    %8 = arith.maximumf %6, %7 : vector<8x128xf32>
    %c0_6 = arith.constant 0 : index
    %c0_7 = arith.constant 0 : index
    %9 = vector.load %arg5[%c0_6, %c0_7] : memref<8x128xf32, #tpu.memory_space<vmem>>, vector<8x128xf32>
    tpu.vector_store %arg5[%c0_6, %c0_7], %8 {strides = array<i32>} : memref<8x128xf32, #tpu.memory_space<vmem>>, vector<8x128xf32>,
    return
  }
  func.func @transform_0(%arg0: i32, %arg1: i32) -> (i32, i32) {
    %c0_i32 = arith.constant 0 : i32
    %c0_i32_0 = arith.constant 0 : i32
    return %arg0, %c0_i32 : i32, i32
  }
  func.func @transform_1(%arg0: i32, %arg1: i32) -> (i32, i32) {
    %c0_i32 = arith.constant 0 : i32
    %c0_i32_0 = arith.constant 0 : i32
    return %c0_i32, %arg1 : i32, i32
  }
  func.func @transform_2(%arg0: i32, %arg1: i32) -> (i32, i32) {
    %c0_i32 = arith.constant 0 : i32
    %c0_i32_0 = arith.constant 0 : i32
    return %c0_i32, %arg1 : i32, i32
  }
  func.func @transform_3(%arg0: i32, %arg1: i32) -> (i32, i32) {
    %c0_i32 = arith.constant 0 : i32
    return %arg0, %arg1 : i32, i32
  }
}

</mosaic_0001>

<bundles_post_ra>
// kernel: tpu_custom_call.1
= control target key start
LH: loop header
LB: loop body
LE: loop exit
PB: predicated region body
PF: predicated region fallthrough
CT: control target
= control target key end

     0   :  { %8 = vsyncpa [#allocation3], 0  ;;  %s2384_s0 = inlined_call_operand.hbm [shape: f32[8,2400], index: 0, kind: input, shape index: {}]   ;;  %s2385_s1 = inlined_call_operand.hbm [shape: bf16[2400,128], index: 1, kind: input, shape index: {}]   ;;  %s2386_s2 = inlined_call_operand.vmem [shape: f32[1,128], index: 2, kind: input, shape index: {}]   ;;  %s2387_s3 = inlined_call_operand.hbm [shape: f32[8,128], index: 3, kind: output, shape index: {}]  }
   0x1   :  { %9 = vsyncpa [#allocation6], 0 }
   0x2   :  { %10 = vsyncpa [#allocation4], 0  ;;  %s2311_s12 = smov [#allocation2]   ;;  %s2312_s14 = smov [#allocation5]  }
   0x3   :  { %s17_s13 = sshll.u32 %s2311_s12, 4  ;;  %s26_s15 = sshll.u32 %s2312_s14, 4  ;;  %s18_s13 = int_to_ptr.vmem [resolvable:$true] %s17_s13  ;;  %s2338_s15 = int_to_ptr.vmem [resolvable:$true] %s26_s15 }
   0x4   :  { %s2239_s18 = scalar_lea.hbm %s2384_s0, 2432 }
   0x5   :  { %p2240_p0 = scmp.ne.s32.totalorder %s2384_s0, %s2239_s18  ;;  %p2243_p1 = scmp.lt.u32.totalorder %s2239_s18, %s2384_s0 }
   0x7   :  { %p2245_p2 = pnand %p2243_p1, %p2240_p0 }
   0x9   :  { %2248 = shalt.err (!%p2245_p2)
}
   0xa   :  { %s2249_s23 = scalar_lea.vmem %s18_s13, 2432  ;;  %p2254_p4 = scmp.lt.s32.totalorder %s18_s13, %s18_s13 }
   0xb   :  { %p2250_p3 = scmp.ne.s32.totalorder %s18_s13, %s2249_s23  ;;  %p2255_p5 = scmp.lt.s32.totalorder %s2249_s23, %s2249_s23 }
   0xd   :  { %p2256_p6 = por %p2255_p5, %p2254_p4 }
   0xf   :  { %p2257_p7 = pnand %p2256_p6, %p2250_p3 }
  0x11   :  { %2260 = shalt.err (!%p2257_p7)
}
  0x12   :  { %20 = dma.hbm_to_vmem [thread:$0]  %s2384_s0, 2432, %s18_s13, [#allocation3]  }
  0x13   :  { %s2261_s28 = scalar_lea.hbm %s2385_s1, 19200 }
  0x14   :  { %p2262_p8 = scmp.ne.s32.totalorder %s2385_s1, %s2261_s28  ;;  %p2265_p9 = scmp.lt.u32.totalorder %s2261_s28, %s2385_s1 }
  0x16   :  { %p2267_p10 = pnand %p2265_p9, %p2262_p8 }
  0x18   :  { %2270 = shalt.err (!%p2267_p10)
}
  0x19   :  { %s2271_s6 = scalar_lea.vmem %s2338_s15, 19200  ;;  %p2276_p12 = scmp.lt.s32.totalorder %s2338_s15, %s2338_s15 }
  0x1a   :  { %p2272_p11 = scmp.ne.s32.totalorder %s2338_s15, %s2271_s6  ;;  %p2277_p13 = scmp.lt.s32.totalorder %s2271_s6, %s2271_s6 }
  0x1c   :  { %p2278_p0 = por %p2277_p13, %p2276_p12 }
  0x1e   :  { %p2279_p1 = pnand %p2278_p0, %p2272_p11 }
  0x20   :  { %2282 = shalt.err (!%p2279_p1)
}
  0x21   :  { %s2313_s0 = smov 64   ;;  %s2314_s7 = smov 4  }
  0x22   :  { %32 = dma.hbm_to_vmem [thread:$0]  %s2385_s1, 19200, %s2338_s15, [#allocation6], %s2313_s0, %s2313_s0, %s2314_s7  }
  0x23   :  { %2305 = dma.done.wait [#allocation3], 2432  }
  0x24   :  { %2306 = vsyncadd [#allocation3], 4294964864 }
  0x25   :  { %2307 = dma.done.wait [#allocation6], 19200  }
  0x26   :  { %2308 = vsyncadd [#allocation6], 4294948096  ;;  %v2089_v0 = vld [vmem:[#allocation5 + $0x40] sm:$0xff]   ;;  %v2093_v4 = vld [vmem:[#allocation5 + $0x48] sm:$0xff]   ;;  %vm2316_vm0 = vmmov 0   ;;  %vm1287_vm1 = vcmask 785408  }
  0x27   :  { %v2090_v1 = vld [vmem:[#allocation5] sm:$0xff]   ;;  %1861 = vmatprep.subr.bf16.mxu0 %v2089_v0  ;;  %v2094_v5 = vld [vmem:[#allocation5 + $0x8] sm:$0xff]   ;;  %v2097_v8 = vld [vmem:[#allocation5 + $0x50] sm:$0xff]  }
  0x28   :  { %v2091_v2 = vld [vmem:[#allocation5 + $0xc0] sm:$0xff]   ;;  %1862 = vmatpush3.bf16.msra.mxu0 %v2090_v1  ;;  %v2095_v6 = vld [vmem:[#allocation5 + $0xc8] sm:$0xff]   ;;  %v2098_v9 = vld [vmem:[#allocation5 + $0x10] sm:$0xff]  }
  0x29   :  { %v2092_v3 = vld [vmem:[#allocation5 + $0x80] sm:$0xff]   ;;  %1883 = vmatprep.subr.bf16.mxu1 %v2091_v2  ;;  %1863 = vmatprep.subr.bf16.mxu0 %v2093_v4  ;;  %v2096_v7 = vld [vmem:[#allocation5 + $0x88] sm:$0xff]   ;;  %v2099_v10 = vld [vmem:[#allocation5 + $0xd0] sm:$0xff]  }
  0x2a   :  { %1884 = vmatpush3.bf16.msra.mxu1 %v2092_v3  ;;  %v2100_v11 = vld [vmem:[#allocation5 + $0x90] sm:$0xff]   ;;  %v2101_v12 = vld [vmem:[#allocation5 + $0x58] sm:$0xff]   ;;  %v2105_v16 = vld [vmem:[#allocation5 + $0x60] sm:$0xff]  }
  0x2b   :  { %1885 = vmatprep.subr.bf16.mxu1 %v2095_v6  ;;  %v2102_v13 = vld [vmem:[#allocation5 + $0x18] sm:$0xff]   ;;  %v2106_v17 = vld [vmem:[#allocation5 + $0x20] sm:$0xff]   ;;  %v2109_v20 = vld [vmem:[#allocation5 + $0x68] sm:$0xff]  }
  0x2c   :  { %1864 = vmatpush3.bf16.msra.mxu0 %v2094_v5  ;;  %v2103_v14 = vld [vmem:[#allocation5 + $0xd8] sm:$0xff]   ;;  %v2107_v18 = vld [vmem:[#allocation5 + $0xe0] sm:$0xff]   ;;  %v2110_v21 = vld [vmem:[#allocation5 + $0x28] sm:$0xff]  }
  0x2d   :  { %1865 = vmatprep.subr.bf16.mxu0 %v2097_v8  ;;  %v2104_v15 = vld [vmem:[#allocation5 + $0x98] sm:$0xff]   ;;  %v2108_v19 = vld [vmem:[#allocation5 + $0xa0] sm:$0xff]   ;;  %v2111_v22 = vld [vmem:[#allocation5 + $0xe8] sm:$0xff]  }
  0x2e   :  { %1886 = vmatpush3.bf16.msra.mxu1 %v2096_v7  ;;  %v2112_v23 = vld [vmem:[#allocation5 + $0xa8] sm:$0xff]   ;;  %v2113_v24 = vld [vmem:[#allocation5 + $0x70] sm:$0xff]   ;;  %v2117_v28 = vld [vmem:[#allocation5 + $0x78] sm:$0xff]  }
  0x2f   :  { %1887 = vmatprep.subr.bf16.mxu1 %v2099_v10  ;;  %v2114_v25 = vld [vmem:[#allocation5 + $0x30] sm:$0xff]   ;;  %v2118_v29 = vld [vmem:[#allocation5 + $0x38] sm:$0xff]   ;;  %v42_v34 = vld [vmem:[#allocation2] sm:$0xff] }
  0x30   :  { %1866 = vmatpush3.bf16.msra.mxu0 %v2098_v9  ;;  %v2115_v26 = vld [vmem:[#allocation5 + $0xf0] sm:$0xff]   ;;  %v2119_v30 = vld [vmem:[#allocation5 + $0xf8] sm:$0xff]   ;;  %v61_v35 = vpack.c.bf16 %v42_v34, %v42_v34  ;;  %v2121_v36 = vld [vmem:[#allocation5 + $0x140] sm:$0xff]  }
  0x31   :  { %1867 = vmatprep.subr.bf16.mxu0 %v2101_v12  ;;  %v2116_v27 = vld [vmem:[#allocation5 + $0xb0] sm:$0xff]   ;;  %v2120_v33 = vld [vmem:[#allocation5 + $0xb8] sm:$0xff]   ;;  %v45_v37 = vld [vmem:[#allocation2 + $0x18] sm:$0xff] }
  0x32   :  { %1888 = vmatpush3.bf16.msra.mxu1 %v2100_v11  ;;  %v43_v31 = vld [vmem:[#allocation2 + $0x8] sm:$0xff]  ;;  %v64_v38 = vpack.c.bf16 %v45_v37, %v45_v37  ;;  %v2122_v39 = vld [vmem:[#allocation5 + $0x100] sm:$0xff]   ;;  %v44_v40 = vld [vmem:[#allocation2 + $0x10] sm:$0xff] }
  0x33   :  { %1889 = vmatprep.subr.bf16.mxu1 %v2103_v14  ;;  %v62_v32 = vpack.c.bf16 %v43_v31, %v43_v31  ;;  %v63_v41 = vpack.c.bf16 %v44_v40, %v44_v40  ;;  %v2123_v42 = vld [vmem:[#allocation5 + $0x1c0] sm:$0xff]   ;;  %v2125_v44 = vld [vmem:[#allocation5 + $0x148] sm:$0xff]   ;;  %v2129_v48 = vld [vmem:[#allocation5 + $0x150] sm:$0xff]  }
  0x34   :  { %1868 = vmatpush3.bf16.msra.mxu0 %v2102_v13  ;;  %1363 = vmatprep.mubr.bf16.mxu1 %v64_v38  ;;  %v2124_v43 = vld [vmem:[#allocation5 + $0x180] sm:$0xff]   ;;  %v2126_v45 = vld [vmem:[#allocation5 + $0x108] sm:$0xff]   ;;  %v2130_v49 = vld [vmem:[#allocation5 + $0x110] sm:$0xff]  }
  0x35   :  { %1869 = vmatprep.subr.bf16.mxu0 %v2105_v16  ;;  %1323 = vmatprep.mubr.bf16.mxu0 %v62_v32  ;;  %v2127_v46 = vld [vmem:[#allocation5 + $0x1c8] sm:$0xff]   ;;  %v2131_v50 = vld [vmem:[#allocation5 + $0x1d0] sm:$0xff]   ;;  %v2133_v52 = vld [vmem:[#allocation5 + $0x158] sm:$0xff]  }
  0x36   :  { %1890 = vmatpush3.bf16.msra.mxu1 %v2104_v15  ;;  %v2128_v47 = vld [vmem:[#allocation5 + $0x188] sm:$0xff]   ;;  %v2132_v51 = vld [vmem:[#allocation5 + $0x190] sm:$0xff]   ;;  %v2134_v53 = vld [vmem:[#allocation5 + $0x118] sm:$0xff]  }
  0x37   :  { %1891 = vmatprep.subr.bf16.mxu1 %v2107_v18  ;;  %v2135_v54 = vld [vmem:[#allocation5 + $0x1d8] sm:$0xff]   ;;  %v2137_v56 = vld [vmem:[#allocation5 + $0x160] sm:$0xff]   ;;  %v2141_v60 = vld [vmem:[#allocation5 + $0x168] sm:$0xff]  }
  0x38   :  { %1870 = vmatpush3.bf16.msra.mxu0 %v2106_v17  ;;  %v2136_v55 = vld [vmem:[#allocation5 + $0x198] sm:$0xff]   ;;  %v2138_v57 = vld [vmem:[#allocation5 + $0x120] sm:$0xff]   ;;  %v2142_v61 = vld [vmem:[#allocation5 + $0x128] sm:$0xff]  }
  0x39   :  { %1871 = vmatprep.subr.bf16.mxu0 %v2109_v20  ;;  %v2139_v58 = vld [vmem:[#allocation5 + $0x1e0] sm:$0xff]   ;;  %v2143_v62 = vld [vmem:[#allocation5 + $0x1e8] sm:$0xff]   ;;  %v2145_v0 = vld [vmem:[#allocation5 + $0x170] sm:$0xff]  }
  0x3a   :  { %1892 = vmatpush3.bf16.msra.mxu1 %v2108_v19  ;;  %v2140_v59 = vld [vmem:[#allocation5 + $0x1a0] sm:$0xff]   ;;  %v2144_v63 = vld [vmem:[#allocation5 + $0x1a8] sm:$0xff]   ;;  %v2146_v1 = vld [vmem:[#allocation5 + $0x130] sm:$0xff]  }
  0x3b   :  { %1893 = vmatprep.subr.bf16.mxu1 %v2111_v22  ;;  %v2147_v2 = vld [vmem:[#allocation5 + $0x1f0] sm:$0xff]   ;;  %v2149_v4 = vld [vmem:[#allocation5 + $0x178] sm:$0xff]   ;;  %v46_v10 = vld [vmem:[#allocation2 + $0x20] sm:$0xff] }
  0x3c   :  { %1872 = vmatpush3.bf16.msra.mxu0 %v2110_v21  ;;  %v2148_v3 = vld [vmem:[#allocation5 + $0x1b0] sm:$0xff]   ;;  %v2150_v5 = vld [vmem:[#allocation5 + $0x138] sm:$0xff]   ;;  %v65_v11 = vpack.c.bf16 %v46_v10, %v46_v10  ;;  %v2153_v12 = vld [vmem:[#allocation5 + $0x240] sm:$0xff]  }
  0x3d   :  { %1873 = vmatprep.subr.bf16.mxu0 %v2113_v24  ;;  %v2151_v6 = vld [vmem:[#allocation5 + $0x1f8] sm:$0xff]   ;;  %v47_v7 = vld [vmem:[#allocation2 + $0x28] sm:$0xff]  ;;  %v49_v13 = vld [vmem:[#allocation2 + $0x38] sm:$0xff] }
  0x3e   :  { %1894 = vmatpush3.bf16.msra.mxu1 %v2112_v23  ;;  %v66_v8 = vpack.c.bf16 %v47_v7, %v47_v7  ;;  %v2152_v9 = vld [vmem:[#allocation5 + $0x1b8] sm:$0xff]   ;;  %v68_v14 = vpack.c.bf16 %v49_v13, %v49_v13  ;;  %v2154_v15 = vld [vmem:[#allocation5 + $0x200] sm:$0xff]   ;;  %v2157_v20 = vld [vmem:[#allocation5 + $0x248] sm:$0xff]  }
  0x3f   :  { %1895 = vmatprep.subr.bf16.mxu1 %v2115_v26  ;;  %v48_v16 = vld [vmem:[#allocation2 + $0x30] sm:$0xff]  ;;  %v2155_v18 = vld [vmem:[#allocation5 + $0x2c0] sm:$0xff]   ;;  %v2158_v21 = vld [vmem:[#allocation5 + $0x208] sm:$0xff]  }
  0x40   :  { %1874 = vmatpush3.bf16.msra.mxu0 %v2114_v25  ;;  %v67_v17 = vpack.c.bf16 %v48_v16, %v48_v16  ;;  %v2156_v19 = vld [vmem:[#allocation5 + $0x280] sm:$0xff]   ;;  %v2159_v22 = vld [vmem:[#allocation5 + $0x2c8] sm:$0xff]   ;;  %v2161_v24 = vld [vmem:[#allocation5 + $0x250] sm:$0xff]  }
  0x41   :  { %1875 = vmatprep.subr.bf16.mxu0 %v2117_v28  ;;  %v2160_v23 = vld [vmem:[#allocation5 + $0x288] sm:$0xff]   ;;  %v2162_v25 = vld [vmem:[#allocation5 + $0x210] sm:$0xff]   ;;  %v2165_v28 = vld [vmem:[#allocation5 + $0x258] sm:$0xff]  }
  0x42   :  { %1896 = vmatpush3.bf16.msra.mxu1 %v2116_v27  ;;  %v2163_v26 = vld [vmem:[#allocation5 + $0x2d0] sm:$0xff]   ;;  %v2168_v31 = vld [vmem:[#allocation5 + $0x298] sm:$0xff]   ;;  %v2169_v32 = vld [vmem:[#allocation5 + $0x260] sm:$0xff]  }
  0x43   :  { %1897 = vmatprep.subr.bf16.mxu1 %v2119_v30  ;;  %v2164_v27 = vld [vmem:[#allocation5 + $0x290] sm:$0xff]   ;;  %v2167_v30 = vld [vmem:[#allocation5 + $0x2d8] sm:$0xff]   ;;  %v2171_v34 = vld [vmem:[#allocation5 + $0x2e0] sm:$0xff]  }
  0x44   :  { %1876 = vmatpush3.bf16.msra.mxu0 %v2118_v29  ;;  %v2166_v29 = vld [vmem:[#allocation5 + $0x218] sm:$0xff]   ;;  %v2174_v37 = vld [vmem:[#allocation5 + $0x228] sm:$0xff]   ;;  %v2177_v40 = vld [vmem:[#allocation5 + $0x270] sm:$0xff]  }
  0x45   :  { %1905 = vmatprep.subr.bf16.mxu0 %v2121_v36  ;;  %v2173_v36 = vld [vmem:[#allocation5 + $0x268] sm:$0xff]   ;;  %v2200_v7 = vld [vmem:[#allocation5 + $0x398] sm:$0xff]   ;;  %v2203_v10 = vld [vmem:[#allocation5 + $0x3e0] sm:$0xff]  }
  0x46   :  { %1898 = vmatpush3.bf16.msra.mxu1 %v2120_v33  ;;  %v2170_v33 = vld [vmem:[#allocation5 + $0x220] sm:$0xff]   ;;  %v2175_v38 = vld [vmem:[#allocation5 + $0x2e8] sm:$0xff]   ;;  %v2209_v16 = vld [vmem:[#allocation5 + $0x370] sm:$0xff]  }
  0x47   :  { %1324 = vmatmul.mubr.bf16.vlgmr.msra.gmra.mrb[0].mxu0 %v61_v35  ;;  %1927 = vmatprep.subr.bf16.mxu1 %v2123_v42  ;;  %v2172_v35 = vld [vmem:[#allocation5 + $0x2a0] sm:$0xff]   ;;  %v2179_v42 = vld [vmem:[#allocation5 + $0x2f0] sm:$0xff]   ;;  %v2206_v13 = vld [vmem:[#allocation5 + $0x328] sm:$0xff]  }
  0x48   :  { %1906 = vmatpush3.bf16.msra.mxu0 %v2122_v39  ;;  %1403 = vmatprep.mubr.bf16.mxu0 %v66_v8  ;;  %v2176_v39 = vld [vmem:[#allocation5 + $0x2a8] sm:$0xff]   ;;  %v2201_v8 = vld [vmem:[#allocation5 + $0x360] sm:$0xff]  }
  0x49   :  { %1364 = vmatmul.mubr.bf16.vlgmr.msra.gmra.mrb[0].mxu1 %v63_v41  ;;  %1907 = vmatprep.subr.bf16.mxu0 %v2125_v44  ;;  %v2178_v41 = vld [vmem:[#allocation5 + $0x230] sm:$0xff]   ;;  %v2181_v44 = vld [vmem:[#allocation5 + $0x278] sm:$0xff]  }
  0x4a   :  { %1928 = vmatpush3.bf16.msra.mxu1 %v2124_v43  ;;  %1443 = vmatprep.mubr.bf16.mxu1 %v68_v14  ;;  %v2180_v43 = vld [vmem:[#allocation5 + $0x2b0] sm:$0xff]   ;;  %v2207_v14 = vld [vmem:[#allocation5 + $0x3e8] sm:$0xff]  }
  0x4b   :  { %1929 = vmatprep.subr.bf16.mxu1 %v2127_v46  ;;  %v2183_v46 = vld [vmem:[#allocation5 + $0x2f8] sm:$0xff]  }
  0x4c   :  { %1908 = vmatpush3.bf16.msra.mxu0 %v2126_v45  ;;  %v2182_v45 = vld [vmem:[#allocation5 + $0x238] sm:$0xff]  }
  0x4d   :  { %1909 = vmatprep.subr.bf16.mxu0 %v2129_v48 }
  0x4e   :  { %1930 = vmatpush3.bf16.msra.mxu1 %v2128_v47  ;;  %v51_v47 = vld [vmem:[#allocation2 + $0x48] sm:$0xff] }
  0x4f   :  { %1931 = vmatprep.subr.bf16.mxu1 %v2131_v50  ;;  %v70_v48 = vpack.c.bf16 %v51_v47, %v51_v47  ;;  %v50_v50 = vld [vmem:[#allocation2 + $0x40] sm:$0xff]  ;;  %v2232_v47 = vld [vmem:[#allocation5 + $0x498] sm:$0xff]  }
  0x50   :  { %1910 = vmatpush3.bf16.msra.mxu0 %v2130_v49  ;;  %v2184_v49 = vld [vmem:[#allocation5 + $0x2b8] sm:$0xff]  }
  0x51   :  { %1911 = vmatprep.subr.bf16.mxu0 %v2133_v52  ;;  %v2185_v52 = vld [vmem:[#allocation5 + $0x340] sm:$0xff]  }
  0x52   :  { %1932 = vmatpush3.bf16.msra.mxu1 %v2132_v51  ;;  %v69_v51 = vpack.c.bf16 %v50_v50, %v50_v50  ;;  %v2235_v50 = vld [vmem:[#allocation5 + $0x4a0] sm:$0xff]  }
  0x53   :  { %1933 = vmatprep.subr.bf16.mxu1 %v2135_v54 }
  0x54   :  { %1912 = vmatpush3.bf16.msra.mxu0 %v2134_v53  ;;  %v53_v53 = vld [vmem:[#allocation2 + $0x58] sm:$0xff] }
  0x55   :  { %1913 = vmatprep.subr.bf16.mxu0 %v2137_v56  ;;  %v72_v54 = vpack.c.bf16 %v53_v53, %v53_v53  ;;  %v52_v56 = vld [vmem:[#allocation2 + $0x50] sm:$0xff]  ;;  %v2234_v53 = vld [vmem:[#allocation5 + $0x430] sm:$0xff]  }
  0x56   :  { %1934 = vmatpush3.bf16.msra.mxu1 %v2136_v55  ;;  %v2186_v55 = vld [vmem:[#allocation5 + $0x300] sm:$0xff]  }
  0x57   :  { %1935 = vmatprep.subr.bf16.mxu1 %v2139_v58  ;;  %v2187_v58 = vld [vmem:[#allocation5 + $0x3c0] sm:$0xff]  }
  0x58   :  { %1914 = vmatpush3.bf16.msra.mxu0 %v2138_v57  ;;  %v71_v57 = vpack.c.bf16 %v52_v56, %v52_v56  ;;  %v60_v56 = vld [vmem:[#allocation2 + $0x90] sm:$0xff] }
  0x59   :  { %1915 = vmatprep.subr.bf16.mxu0 %v2141_v60  ;;  %v2189_v60 = vld [vmem:[#allocation5 + $0x348] sm:$0xff]  }
  0x5a   :  { %1936 = vmatpush3.bf16.msra.mxu1 %v2140_v59  ;;  %v2188_v59 = vld [vmem:[#allocation5 + $0x380] sm:$0xff]  }
  0x5b   :  { %1937 = vmatprep.subr.bf16.mxu1 %v2143_v62  ;;  %v2191_v62 = vld [vmem:[#allocation5 + $0x3c8] sm:$0xff]  }
  0x5c   :  { %1916 = vmatpush3.bf16.msra.mxu0 %v2142_v61  ;;  %v2190_v61 = vld [vmem:[#allocation5 + $0x308] sm:$0xff]  }
  0x5d   :  { %1917 = vmatprep.subr.bf16.mxu0 %v2145_v0  ;;  %v2193_v0 = vld [vmem:[#allocation5 + $0x350] sm:$0xff]  }
  0x5e   :  { %1938 = vmatpush3.bf16.msra.mxu1 %v2144_v63  ;;  %v2192_v63 = vld [vmem:[#allocation5 + $0x388] sm:$0xff]  }
  0x5f   :  { %1939 = vmatprep.subr.bf16.mxu1 %v2147_v2  ;;  %v2195_v2 = vld [vmem:[#allocation5 + $0x3d0] sm:$0xff]  }
  0x60   :  { %1918 = vmatpush3.bf16.msra.mxu0 %v2146_v1  ;;  %v2194_v1 = vld [vmem:[#allocation5 + $0x310] sm:$0xff]  }
  0x61   :  { %1919 = vmatprep.subr.bf16.mxu0 %v2149_v4  ;;  %v2197_v4 = vld [vmem:[#allocation5 + $0x358] sm:$0xff]  }
  0x62   :  { %1940 = vmatpush3.bf16.msra.mxu1 %v2148_v3  ;;  %v2196_v3 = vld [vmem:[#allocation5 + $0x390] sm:$0xff]  }
  0x63   :  { %1941 = vmatprep.subr.bf16.mxu1 %v2151_v6  ;;  %v2199_v6 = vld [vmem:[#allocation5 + $0x3d8] sm:$0xff]  }
  0x64   :  { %1920 = vmatpush3.bf16.msra.mxu0 %v2150_v5  ;;  %v2198_v5 = vld [vmem:[#allocation5 + $0x318] sm:$0xff]  }
  0x65   :  { %1949 = vmatprep.subr.bf16.mxu0 %v2153_v12  ;;  %v2205_v12 = vld [vmem:[#allocation5 + $0x368] sm:$0xff]  }
  0x66   :  { %1942 = vmatpush3.bf16.msra.mxu1 %v2152_v9  ;;  %v2202_v9 = vld [vmem:[#allocation5 + $0x320] sm:$0xff]  }
  0x67   :  { %1404 = vmatmul.mubr.bf16.vlgmr.msra.gmra.mrb[4].mxu0 %v65_v11  ;;  %1971 = vmatprep.subr.bf16.mxu1 %v2155_v18  ;;  %v2204_v11 = vld [vmem:[#allocation5 + $0x3a0] sm:$0xff]   ;;  %v2211_v18 = vld [vmem:[#allocation5 + $0x3f0] sm:$0xff]  }
  0x68   :  { %1950 = vmatpush3.bf16.msra.mxu0 %v2154_v15  ;;  %1483 = vmatprep.mubr.bf16.mxu0 %v70_v48  ;;  %v2208_v15 = vld [vmem:[#allocation5 + $0x3a8] sm:$0xff]  }
  0x69   :  { %1444 = vmatmul.mubr.bf16.vlgmr.msra.gmra.mrb[4].mxu1 %v67_v17  ;;  %1951 = vmatprep.subr.bf16.mxu0 %v2157_v20  ;;  %v2210_v17 = vld [vmem:[#allocation5 + $0x330] sm:$0xff]   ;;  %v2213_v20 = vld [vmem:[#allocation5 + $0x378] sm:$0xff]   ;;  %v2231_v48 = vld [vmem:[#allocation5 + $0x428] sm:$0xff]  }
  0x6a   :  { %1972 = vmatpush3.bf16.msra.mxu1 %v2156_v19  ;;  %1523 = vmatprep.mubr.bf16.mxu1 %v72_v54  ;;  %v2212_v19 = vld [vmem:[#allocation5 + $0x3b0] sm:$0xff]   ;;  %v2236_v54 = vld [vmem:[#allocation5 + $0x478] sm:$0xff]  }
  0x6b   :  { %1973 = vmatprep.subr.bf16.mxu1 %v2159_v22  ;;  %v2215_v22 = vld [vmem:[#allocation5 + $0x3f8] sm:$0xff]  }
  0x6c   :  { %1952 = vmatpush3.bf16.msra.mxu0 %v2158_v21  ;;  %v2214_v21 = vld [vmem:[#allocation5 + $0x338] sm:$0xff]  }
  0x6d   :  { %1953 = vmatprep.subr.bf16.mxu0 %v2161_v24 }
  0x6e   :  { %1974 = vmatpush3.bf16.msra.mxu1 %v2160_v23  ;;  %v55_v23 = vld [vmem:[#allocation2 + $0x68] sm:$0xff] }
  0x6f   :  { %1975 = vmatprep.subr.bf16.mxu1 %v2163_v26  ;;  %v74_v24 = vpack.c.bf16 %v55_v23, %v55_v23  ;;  %v54_v26 = vld [vmem:[#allocation2 + $0x60] sm:$0xff] }
  0x70   :  { %1954 = vmatpush3.bf16.msra.mxu0 %v2162_v25  ;;  %v2216_v25 = vld [vmem:[#allocation5 + $0x3b8] sm:$0xff]  }
  0x71   :  { %1955 = vmatprep.subr.bf16.mxu0 %v2165_v28  ;;  %v2217_v28 = vld [vmem:[#allocation5 + $0x440] sm:$0xff]  }
  0x72   :  { %1976 = vmatpush3.bf16.msra.mxu1 %v2164_v27  ;;  %v73_v27 = vpack.c.bf16 %v54_v26, %v54_v26 }
  0x73   :  { %1977 = vmatprep.subr.bf16.mxu1 %v2167_v30 }
  0x74   :  { %1956 = vmatpush3.bf16.msra.mxu0 %v2166_v29  ;;  %v57_v29 = vld [vmem:[#allocation2 + $0x78] sm:$0xff] }
  0x75   :  { %1957 = vmatprep.subr.bf16.mxu0 %v2169_v32  ;;  %v76_v30 = vpack.c.bf16 %v57_v29, %v57_v29  ;;  %v56_v32 = vld [vmem:[#allocation2 + $0x70] sm:$0xff] }
  0x76   :  { %1978 = vmatpush3.bf16.msra.mxu1 %v2168_v31  ;;  %v2218_v31 = vld [vmem:[#allocation5 + $0x400] sm:$0xff]  }
  0x77   :  { %1979 = vmatprep.subr.bf16.mxu1 %v2171_v34  ;;  %v2219_v34 = vld [vmem:[#allocation5 + $0x448] sm:$0xff]  }
  0x78   :  { %1958 = vmatpush3.bf16.msra.mxu0 %v2170_v33  ;;  %v75_v33 = vpack.c.bf16 %v56_v32, %v56_v32 }
  0x79   :  { %1959 = vmatprep.subr.bf16.mxu0 %v2173_v36  ;;  %v2315_v36 = vmov 0.0  }
  0x7a   :  { %1980 = vmatpush3.bf16.msra.mxu1 %v2172_v35  ;;  %v2220_v35 = vld [vmem:[#allocation5 + $0x408] sm:$0xff]  }
  0x7b   :  { %1981 = vmatprep.subr.bf16.mxu1 %v2175_v38  ;;  %v2222_v38 = vld [vmem:[#allocation5 + $0x410] sm:$0xff]  }
  0x7c   :  { %1960 = vmatpush3.bf16.msra.mxu0 %v2174_v37  ;;  %v2221_v37 = vld [vmem:[#allocation5 + $0x450] sm:$0xff]  }
  0x7d   :  { %1961 = vmatprep.subr.bf16.mxu0 %v2177_v40  ;;  %v2224_v40 = vld [vmem:[#allocation5 + $0x458] sm:$0xff]  }
  0x7e   :  { %1982 = vmatpush3.bf16.msra.mxu1 %v2176_v39  ;;  %v2223_v39 = vld [vmem:[#allocation5 + $0x480] sm:$0xff]  }
  0x7f   :  { %1983 = vmatprep.subr.bf16.mxu1 %v2179_v42  ;;  %v2225_v42 = vld [vmem:[#allocation5 + $0x418] sm:$0xff]  }
  0x80   :  { %1962 = vmatpush3.bf16.msra.mxu0 %v2178_v41  ;;  %v2226_v41 = vld [vmem:[#allocation5 + $0x488] sm:$0xff]  }
  0x81   :  { %1963 = vmatprep.subr.bf16.mxu0 %v2181_v44  ;;  %v2229_v44 = vld [vmem:[#allocation5 + $0x490] sm:$0xff]  }
  0x82   :  { %1984 = vmatpush3.bf16.msra.mxu1 %v2180_v43  ;;  %v2227_v43 = vld [vmem:[#allocation5 + $0x460] sm:$0xff]  }
  0x83   :  { %1985 = vmatprep.subr.bf16.mxu1 %v2183_v46  ;;  %v2230_v46 = vld [vmem:[#allocation5 + $0x468] sm:$0xff]  }
  0x84   :  { %1964 = vmatpush3.bf16.msra.mxu0 %v2182_v45  ;;  %v2228_v45 = vld [vmem:[#allocation5 + $0x420] sm:$0xff]  }
  0x85   :  { %1993 = vmatprep.subr.bf16.mxu0 %v2185_v52 }
  0x86   :  { %1986 = vmatpush3.bf16.msra.mxu1 %v2184_v49  ;;  %v2233_v49 = vld [vmem:[#allocation5 + $0x470] sm:$0xff]  }
  0x87   :  { %1484 = vmatmul.mubr.bf16.vlgmr.msra.gmra.mrb[8].mxu0 %v69_v51  ;;  %2015 = vmatprep.subr.bf16.mxu1 %v2187_v58  ;;  %v59_v51 = vld [vmem:[#allocation2 + $0x88] sm:$0xff]  ;;  %v58_v58 = vld [vmem:[#allocation2 + $0x80] sm:$0xff] }
  0x88   :  { %1994 = vmatpush3.bf16.msra.mxu0 %v2186_v55  ;;  %1563 = vmatprep.mubr.bf16.mxu0 %v74_v24  ;;  %v78_v52 = vpack.c.bf16 %v59_v51, %v59_v51  ;;  %v2238_v55 = vld [vmem:[#allocation5 + $0x4a8] sm:$0xff]  }
  0x89   :  { %1524 = vmatmul.mubr.bf16.vlgmr.msra.gmra.mrb[8].mxu1 %v71_v57  ;;  %1995 = vmatprep.subr.bf16.mxu0 %v2189_v60  ;;  %v2237_v57 = vld [vmem:[#allocation5 + $0x438] sm:$0xff]   ;;  %v77_v60 = vpack.c.bf16 %v58_v58, %v58_v58 }
  0x8a   :  { %2016 = vmatpush3.bf16.msra.mxu1 %v2188_v59  ;;  %1603 = vmatprep.mubr.bf16.mxu1 %v76_v30  ;;  %v79_v59 = vpack.c.bf16 %v60_v56, %v60_v56 }
  0x8b   :  { %2017 = vmatprep.subr.bf16.mxu1 %v2191_v62  ;;  %v1709_v62 = vld [vmem:[%s2386_s2] ss:$0 sm:$0xff]  ;;  %s2317_s2 = smov [#allocation7]  }
  0x8c   :  { %1996 = vmatpush3.bf16.msra.mxu0 %v2190_v61  ;;  %s1699_s11 = sshll.u32 %s2317_s2, 4  ;;  %s1700_s11 = int_to_ptr.vmem [resolvable:$true] %s1699_s11 }
  0x8d   :  { %1997 = vmatprep.subr.bf16.mxu0 %v2193_v0  ;;  %s2283_s12 = scalar_lea.vmem %s1700_s11, 128  ;;  %p2288_p3 = scmp.lt.s32.totalorder %s1700_s11, %s1700_s11 }
  0x8e   :  { %2018 = vmatpush3.bf16.msra.mxu1 %v2192_v63  ;;  %p2284_p2 = scmp.ne.s32.totalorder %s1700_s11, %s2283_s12  ;;  %p2289_p4 = scmp.lt.s32.totalorder %s2283_s12, %s2283_s12 }
  0x8f   :  { %2019 = vmatprep.subr.bf16.mxu1 %v2195_v2 }
  0x90   :  { %1998 = vmatpush3.bf16.msra.mxu0 %v2194_v1  ;;  %p2290_p5 = por %p2289_p4, %p2288_p3 }
  0x91   :  { %1999 = vmatprep.subr.bf16.mxu0 %v2197_v4 }
  0x92   :  { %2020 = vmatpush3.bf16.msra.mxu1 %v2196_v3  ;;  %p2291_p6 = pnand %p2290_p5, %p2284_p2 }
  0x93   :  { %2021 = vmatprep.subr.bf16.mxu1 %v2199_v6 }
  0x94   :  { %2000 = vmatpush3.bf16.msra.mxu0 %v2198_v5 }
  0x95   :  { %2001 = vmatprep.subr.bf16.mxu0 %v2201_v8 }
  0x96   :  { %2022 = vmatpush3.bf16.msra.mxu1 %v2200_v7 }
  0x97   :  { %2023 = vmatprep.subr.bf16.mxu1 %v2203_v10 }
  0x98   :  { %2002 = vmatpush3.bf16.msra.mxu0 %v2202_v9 }
  0x99   :  { %2003 = vmatprep.subr.bf16.mxu0 %v2205_v12 }
  0x9a   :  { %2024 = vmatpush3.bf16.msra.mxu1 %v2204_v11 }
  0x9b   :  { %2025 = vmatprep.subr.bf16.mxu1 %v2207_v14 }
  0x9c   :  { %2004 = vmatpush3.bf16.msra.mxu0 %v2206_v13 }
  0x9d   :  { %2005 = vmatprep.subr.bf16.mxu0 %v2209_v16 }
  0x9e   :  { %2026 = vmatpush3.bf16.msra.mxu1 %v2208_v15 }
  0x9f   :  { %2027 = vmatprep.subr.bf16.mxu1 %v2211_v18 }
  0xa0   :  { %2006 = vmatpush3.bf16.msra.mxu0 %v2210_v17 }
  0xa1   :  { %2007 = vmatprep.subr.bf16.mxu0 %v2213_v20 }
  0xa2   :  { %2028 = vmatpush3.bf16.msra.mxu1 %v2212_v19 }
  0xa3   :  { %2029 = vmatprep.subr.bf16.mxu1 %v2215_v22 }
  0xa4   :  { %2008 = vmatpush3.bf16.msra.mxu0 %v2214_v21 }
  0xa5   :  { %2037 = vmatprep.subr.bf16.mxu0 %v2217_v28 }
  0xa6   :  { %2030 = vmatpush3.bf16.msra.mxu1 %v2216_v25 }
  0xa7   :  { %1564 = vmatmul.mubr.bf16.vlgmr.msra.gmra.mrb[12].mxu0 %v73_v27  ;;  %2066 = vmatprep.subr.bf16.mxu1 %v2315_v36 }
  0xa8   :  { %2038 = vmatpush3.bf16.msra.mxu0 %v2218_v31  ;;  %1643 = vmatprep.mubr.bf16.mxu0 %v78_v52 }
  0xa9   :  { %1604 = vmatmul.mubr.bf16.vlgmr.msra.gmra.mrb[12].mxu1 %v75_v33  ;;  %2039 = vmatprep.subr.bf16.mxu0 %v2219_v34 }
  0xaa   :  { %2078 = vmatprep.mubr.msk.bf16.mxu1 %vm2316_vm0, %v2315_v36  ;;  %2067 = vmatpush3.bf16.msra.mxu1 %v2223_v39 }
  0xab   :  { %2068 = vmatprep.subr.bf16.mxu1 %v2315_v36 }
  0xac   :  { %2040 = vmatpush3.bf16.msra.mxu0 %v2220_v35 }
  0xad   :  { %2041 = vmatprep.subr.bf16.mxu0 %v2221_v37 }
  0xae   :  { %2069 = vmatpush3.bf16.msra.mxu1 %v2226_v41 }
  0xaf   :  { %2070 = vmatprep.subr.bf16.mxu1 %v2315_v36 }
  0xb0   :  { %2042 = vmatpush3.bf16.msra.mxu0 %v2222_v38 }
  0xb1   :  { %2043 = vmatprep.subr.bf16.mxu0 %v2224_v40 }
  0xb2   :  { %2071 = vmatpush3.bf16.msra.mxu1 %v2229_v44 }
  0xb3   :  { %2072 = vmatprep.subr.bf16.mxu1 %v2315_v36 }
  0xb4   :  { %2044 = vmatpush3.bf16.msra.mxu0 %v2225_v42 }
  0xb5   :  { %2045 = vmatprep.subr.bf16.mxu0 %v2227_v43 }
  0xb6   :  { %2073 = vmatpush3.bf16.msra.mxu1 %v2232_v47 }
  0xb7   :  { %2074 = vmatprep.subr.bf16.mxu1 %v2315_v36 }
  0xb8   :  { %2046 = vmatpush3.bf16.msra.mxu0 %v2228_v45 }
  0xb9   :  { %2047 = vmatprep.subr.bf16.mxu0 %v2230_v46 }
  0xba   :  { %2075 = vmatpush3.bf16.msra.mxu1 %v2235_v50 }
  0xbb   :  { %2076 = vmatprep.subr.bf16.mxu1 %v2315_v36 }
  0xbc   :  { %2048 = vmatpush3.bf16.msra.mxu0 %v2231_v48 }
  0xbd   :  { %2049 = vmatprep.subr.bf16.mxu0 %v2233_v49 }
  0xbe   :  { %2077 = vmatpush3.bf16.msra.mxu1 %v2238_v55 }
  0xc0   :  { %2050 = vmatpush3.bf16.msra.mxu0 %v2234_v53 }
  0xc1   :  { %2051 = vmatprep.subr.bf16.mxu0 %v2236_v54  ;;  %2079 = vmatmul.mubr.msk.bf16.vlgmr.msra.gmra.mrb[16].mxu1 %vm1287_vm1, %v79_v59 }
  0xc4   :  { %2052 = vmatpush3.bf16.msra.mxu0 %v2237_v57 }
  0xc7   :  { %1644 = vmatmul.mubr.bf16.vlgmr.msra.gmra.mrb[16].mxu0 %v77_v60 }
 0x11a   :  { %v1877_v61 = vpop.f32.mrb[0].mxu0 }
 0x11b   :  { %v1878_v63 = vpop.f32.mrb[1].mxu0 }
 0x11c   :  { %v1879_v0 = vadd.f32 %v1878_v63, %v1877_v61  ;;  %v1880_v1 = vpop.f32.mrb[2].mxu0  ;;  %v1899_v2 = vpop.f32.mrb[0].mxu1 }
 0x11d   :  { %v1881_v3 = vpop.f32.mrb[3].mxu0  ;;  %v1900_v5 = vpop.f32.mrb[1].mxu1 }
 0x11e   :  { %v1326_v4 = vadd.f32 %v1879_v0, %v1709_v62  ;;  %v1901_v6 = vadd.f32 %v1900_v5, %v1899_v2  ;;  %v1902_v7 = vpop.f32.mrb[2].mxu1 }
 0x11f   :  { %v1903_v8 = vpop.f32.mrb[3].mxu1 }
 0x120   :  { %v1366_v9 = vadd.f32 %v1901_v6, %v1326_v4 }
 0x13a   :  { %v1921_v10 = vpop.f32.mrb[4].mxu0 }
 0x13b   :  { %v1922_v11 = vpop.f32.mrb[5].mxu0 }
 0x13c   :  { %v1923_v12 = vadd.f32 %v1922_v11, %v1921_v10  ;;  %v1924_v13 = vpop.f32.mrb[6].mxu0  ;;  %v1943_v14 = vpop.f32.mrb[4].mxu1 }
 0x13d   :  { %v1925_v15 = vpop.f32.mrb[7].mxu0  ;;  %v1944_v17 = vpop.f32.mrb[5].mxu1 }
 0x13e   :  { %v1406_v16 = vadd.f32 %v1923_v12, %v1366_v9  ;;  %v1945_v18 = vadd.f32 %v1944_v17, %v1943_v14  ;;  %v1946_v19 = vpop.f32.mrb[6].mxu1 }
 0x13f   :  { %v1947_v20 = vpop.f32.mrb[7].mxu1 }
 0x140   :  { %v1446_v21 = vadd.f32 %v1945_v18, %v1406_v16 }
 0x15a   :  { %v1965_v22 = vpop.f32.mrb[8].mxu0 }
 0x15b   :  { %v1966_v23 = vpop.f32.mrb[9].mxu0 }
 0x15c   :  { %v1967_v24 = vadd.f32 %v1966_v23, %v1965_v22  ;;  %v1968_v25 = vpop.f32.mrb[10].mxu0  ;;  %v1987_v26 = vpop.f32.mrb[8].mxu1 }
 0x15d   :  { %v1969_v27 = vpop.f32.mrb[11].mxu0  ;;  %v1988_v28 = vpop.f32.mrb[9].mxu1 }
 0x15e   :  { %v1486_v29 = vadd.f32 %v1967_v24, %v1446_v21  ;;  %v1989_v30 = vadd.f32 %v1988_v28, %v1987_v26  ;;  %v1990_v31 = vpop.f32.mrb[10].mxu1 }
 0x15f   :  { %v1991_v32 = vpop.f32.mrb[11].mxu1 }
 0x160   :  { %v1526_v33 = vadd.f32 %v1989_v30, %v1486_v29 }
 0x17a   :  { %v2009_v34 = vpop.f32.mrb[12].mxu0 }
 0x17b   :  { %v2010_v35 = vpop.f32.mrb[13].mxu0 }
 0x17c   :  { %v2011_v36 = vadd.f32 %v2010_v35, %v2009_v34  ;;  %v2012_v37 = vpop.f32.mrb[14].mxu0  ;;  %v2031_v38 = vpop.f32.mrb[12].mxu1 }
 0x17d   :  { %v2013_v39 = vpop.f32.mrb[15].mxu0  ;;  %v2032_v41 = vpop.f32.mrb[13].mxu1 }
 0x17e   :  { %v1566_v40 = vadd.f32 %v2011_v36, %v1526_v33  ;;  %v2033_v42 = vadd.f32 %v2032_v41, %v2031_v38  ;;  %v2034_v43 = vpop.f32.mrb[14].mxu1 }
 0x17f   :  { %v2035_v44 = vpop.f32.mrb[15].mxu1 }
 0x180   :  { %v1606_v45 = vadd.f32 %v2033_v42, %v1566_v40 }
 0x194   :  { %v1685_v46 = vpop.f32.mrb[16].mxu1 }
 0x195   :  { %v2080_v47 = vpop.f32.mrb[17].mxu1 }
 0x196   :  { %v1688_v49 = vpop.f32.mrb[18].mxu1 }
 0x197   :  { %v2081_v51 = vpop.f32.mrb[19].mxu1 }
 0x19a   :  { %v2053_v48 = vpop.f32.mrb[16].mxu0 }
 0x19b   :  { %v2054_v50 = vpop.f32.mrb[17].mxu0 }
 0x19c   :  { %v2055_v52 = vadd.f32 %v2054_v50, %v2053_v48  ;;  %v2056_v53 = vpop.f32.mrb[18].mxu0 }
 0x19d   :  { %v2057_v54 = vpop.f32.mrb[19].mxu0 }
 0x19e   :  { %v1646_v55 = vadd.f32 %v2055_v52, %v1606_v45 }
 0x1a0   :  { %v1686_v56 = vadd.f32 %v1685_v46, %v1646_v55 }
 0x1a2   :  { %v1691_v57 = vmax.f32 %v1686_v56, 0.0 }
 0x1a4   :  { %1692 = vst [vmem:[#allocation7] sm:$0xff] %v1691_v57 }
 0x1a5   :  { %2294 = shalt.err (!%p2291_p6)
}
 0x1a6   :  { %s2295_s15 = scalar_lea.hbm %s2387_s3, 128 }
 0x1a7   :  { %p2296_p7 = scmp.ne.s32.totalorder %s2387_s3, %s2295_s15  ;;  %p2299_p8 = scmp.lt.u32.totalorder %s2295_s15, %s2387_s3 }
 0x1a9   :  { %p2301_p9 = pnand %p2299_p8, %p2296_p7 }
 0x1ab   :  { %2304 = shalt.err (!%p2301_p9)
}
 0x1ac   :  { %1702 = dma.vmem_to_hbm [thread:$0]  %s1700_s11, 128, %s2387_s3, [#allocation4]  }
 0x1ad   :  { %2309 = dma.done.wait [#allocation4], 128  }
 0x1ae   :  { %2310 = vsyncadd [#allocation4], 4294967168 }
 0x1af   :  { %1706 = vsyncpa [#allocation3], 1 }
 0x1b0   :  { %1707 = vsyncpa [#allocation6], 1 }
 0x1b1   :  { %1708 = vsyncpa [#allocation4], 1 }

</bundles_post_ra>
